<compile_context>
chip_gen: v5e
topology: v5e:2x2
jax: 0.10.0
libtpu: 0.0.40
codegen_flags: <defaults>
</compile_context>

<pallas_src>
import math
from functools import partial

import numpy as np
import jax
import jax.numpy as jnp
from jax.experimental import pallas as pl
from jax.experimental.pallas import tpu as pltpu


# ---------------------------------------------------------------------------
# Pallas kernels
# ---------------------------------------------------------------------------

def _paste_padded(x_ref, pad_ref, h_t, w_l, Hi, Wi):
    """Fuse F.pad into the kernel: zero only the border strips of the VMEM
    slab and paste the raw input tile into its interior."""
    TB, Hp, Wp = pad_ref.shape
    h_b = Hp - h_t - Hi
    w_r = Wp - w_l - Wi
    if h_t > 0:
        pad_ref[:, 0:h_t, :] = jnp.zeros((TB, h_t, Wp), jnp.float32)
    if h_b > 0:
        pad_ref[:, h_t + Hi:Hp, :] = jnp.zeros((TB, h_b, Wp), jnp.float32)
    if w_l > 0:
        pad_ref[:, h_t:h_t + Hi, 0:w_l] = jnp.zeros((TB, Hi, w_l), jnp.float32)
    if w_r > 0:
        pad_ref[:, h_t:h_t + Hi, w_l + Wi:Wp] = jnp.zeros((TB, Hi, w_r),
                                                          jnp.float32)
    pad_ref[:, h_t:h_t + Hi, w_l:w_l + Wi] = x_ref[...].astype(jnp.float32)


def _fir_sep_kernel(x_ref, o_ref, pad_ref, hbuf_ref, *, h_t, w_l,
                    taps_h, taps_v):
    """Separable FIR: horizontal 1-D pass into a VMEM row buffer, then a
    vertical 1-D pass (kh + kw MACs per output). Taps are compile-time
    immediates, so every tap is a single vmul on the VPU."""
    TB, Hi, Wi = x_ref.shape
    _, Ho, Wo = o_ref.shape
    _paste_padded(x_ref, pad_ref, h_t, w_l, Hi, Wi)

    # Horizontal pass over the padded slab: hbuf[:, m, v] = sum_j kw[j]*x[m, v+j]
    hb = taps_h[0] * pad_ref[:, :, 0:Wo]
    for j in range(1, len(taps_h)):
        hb = hb + taps_h[j] * pad_ref[:, :, j:j + Wo]
    hbuf_ref[...] = hb

    # Vertical pass: y[:, u, v] = sum_i kv[i] * hbuf[:, u+i, v]
    acc = taps_v[0] * hbuf_ref[:, 0:Ho, :]
    for i in range(1, len(taps_v)):
        acc = acc + taps_v[i] * hbuf_ref[:, i:i + Ho, :]
    o_ref[...] = acc.astype(o_ref.dtype)


def _fir_full_kernel(x_ref, o_ref, pad_ref, *, h_t, w_l, taps_2d):
    """Generic (non-separable) FIR: shifted-slice accumulate with constant
    taps; structurally-zero taps are skipped at trace time."""
    TB, Hi, Wi = x_ref.shape
    _, Ho, Wo = o_ref.shape
    _paste_padded(x_ref, pad_ref, h_t, w_l, Hi, Wi)

    acc = None
    for i, row in enumerate(taps_2d):
        for j, tap in enumerate(row):
            if tap == 0.0:
                continue
            term = tap * pad_ref[:, i:i + Ho, j:j + Wo]
            acc = term if acc is None else acc + term
    if acc is None:
        acc = jnp.zeros(o_ref.shape, jnp.float32)
    o_ref[...] = acc.astype(o_ref.dtype)


# ---------------------------------------------------------------------------
# pallas_call wrapper
# ---------------------------------------------------------------------------

def _depthwise_fir(x, *, pad, kh, kw, taps_h, taps_v, taps_2d,
                   vmem_budget_bytes=10 * 2**20):
    """x: (N, Hi, Wi) (N = B*C). Returns the valid FIR output (N, Ho, Wo)
    with PyTorch conv2d semantics (cross-correlation, stride 1); the F.pad
    borders are fused inside the kernel."""
    N, Hi, Wi = x.shape
    w_l, w_r, h_t, h_b = (int(p) for p in pad)
    assert min(w_l, w_r, h_t, h_b) >= 0, "negative pads not supported"
    Hp, Wp = Hi + h_t + h_b, Wi + w_l + w_r
    Ho, Wo = Hp - kh + 1, Wp - kw + 1
    out_dtype = x.dtype
    sep = taps_h is not None

    # ---- pick images-per-grid-step so the working set is MiB-scale --------
    # (double-buffered input/output + padded slab + separable row buffer)
    per_img = (2 * Hi * Wi * x.dtype.itemsize
               + 2 * Ho * Wo * jnp.dtype(out_dtype).itemsize
               + Hp * Wp * 4
               + (Hp * Wo * 4 if sep else 0))
    TB = max(1, int(vmem_budget_bytes // max(per_img, 1)))
    TB = min(TB, N)
    if N >= 2:                         # keep >=2 grid steps for v7x's 2 TCs
        TB = min(TB, (N + 1) // 2)
    n_blocks = pl.cdiv(N, TB)
    Np = n_blocks * TB
    if Np != N:                        # pad batch so every block is full
        x = jnp.pad(x, ((0, Np - N), (0, 0), (0, 0)))
    # TODO(synk): H-tile with a (kh-1)-row halo for feature maps too large
    # for a single VMEM slab (v7x 64 MiB VMEM).

    if sep:
        kernel = partial(_fir_sep_kernel, h_t=h_t, w_l=w_l,
                         taps_h=taps_h, taps_v=taps_v)
        scratch = [pltpu.VMEM((TB, Hp, Wp), jnp.float32),
                   pltpu.VMEM((TB, Hp, Wo), jnp.float32)]
    else:
        kernel = partial(_fir_full_kernel, h_t=h_t, w_l=w_l, taps_2d=taps_2d)
        scratch = [pltpu.VMEM((TB, Hp, Wp), jnp.float32)]

    y = pl.pallas_call(
        kernel,
        out_shape=jax.ShapeDtypeStruct((Np, Ho, Wo), out_dtype),
        grid=(n_blocks,),
        in_specs=[pl.BlockSpec((TB, Hi, Wi), lambda n: (n, 0, 0))],
        out_specs=pl.BlockSpec((TB, Ho, Wo), lambda n: (n, 0, 0)),
        scratch_shapes=scratch,
        compiler_params=pltpu.CompilerParams(
            dimension_semantics=("parallel",),
            vmem_limit_bytes=48 * 1024 * 1024),
    )(x)
    return y[:N] if Np != N else y


# ---------------------------------------------------------------------------
# Module
# ---------------------------------------------------------------------------

class UpFirDn2D:
    """JAX/Pallas port of the PyTorch UpFirDn2D module (depthwise FIR with
    optional zero-insertion upsample and stride-subsample)."""

    def __init__(self, kernel, channels, up_factor=1, dn_factor=1):
        K = np.asarray(kernel, dtype=np.float64)
        assert K.ndim == 2
        self.kernel = jnp.asarray(K, jnp.float32)
        self.channels = channels
        self.up_factor = up_factor
        self.dn_factor = dn_factor
        self.kh, self.kw = K.shape

        # ---- padding: identical to the PyTorch module ----
        pad_0 = None
        pad_1 = None
        flt_dim = K.shape[1]
        if up_factor != 1:
            pad = flt_dim - up_factor
            pad_0 = (pad + 1) // 2 + up_factor - 1
            pad_1 = pad // 2
        if dn_factor != 1:
            pad = flt_dim - dn_factor
            pad_0 = (pad + 1) // 2
            pad_1 = pad // 2
        if pad_0 is None and pad_1 is None:
            pad_0 = (flt_dim - 1) / 2
            pad_1 = (flt_dim - 1) / 2
            # F.pad order: (W_left, W_right, H_top, H_bottom)
            self.pad = [int(pad_0), math.ceil(pad_0),
                        int(pad_1), math.ceil(pad_1)]
        else:
            self.pad = [int(pad_0), int(pad_1), int(pad_0), int(pad_1)]

        # ---- FIR taps as compile-time Python constants (review item 1) ----
        # Rank-1 (separable) kernels take the two-pass kh+kw path.
        U, S, Vt = np.linalg.svd(K)
        separable = (min(self.kh, self.kw) == 1) or \
                    (S[1] <= 1e-6 * max(S[0], 1e-30))
        if separable:
            self._taps_v = tuple(float(t) for t in (U[:, 0] * S[0]))
            self._taps_h = tuple(float(t) for t in Vt[0, :])
            self._taps_2d = None
        else:
            self._taps_v = None
            self._taps_h = None
            self._taps_2d = tuple(tuple(float(t) for t in row) for row in K)

    def __call__(self, x):
        b, c, h, w = x.shape
        assert c == self.channels

        # --- ShuffleUpsample: zero-insertion (value lands at (i*f, j*f)) ---
        # TODO(synk): replace with an in-kernel polyphase formulation so the
        # f^2-larger zero-inserted slab is never written to HBM and the MACs
        # that hit inserted zeros are skipped.
        if self.up_factor != 1:
            f = self.up_factor
            x = x.reshape(b, c, h, 1, w, 1)
            x = jnp.pad(x, ((0, 0), (0, 0), (0, 0), (0, f - 1),
                            (0, 0), (0, f - 1)))
            x = x.reshape(b, c, h * f, w * f)

        # --- F.pad + Filter2D fused in the Pallas kernel ---
        b2, c2, Hi, Wi = x.shape
        xf = x.reshape(b2 * c2, Hi, Wi)
        y = _depthwise_fir(xf, pad=self.pad, kh=self.kh, kw=self.kw,
                           taps_h=self._taps_h, taps_v=self._taps_v,
                           taps_2d=self._taps_2d)
        y = y.reshape(b2, c2, y.shape[1], y.shape[2])

        # --- SubSample ---
        # TODO(synk): fold the dn-stride into the kernel (phase-split input or
        # strided VMEM reads) to cut output writeback and MACs by dn^2.
        if self.dn_factor != 1:
            y = y[:, :, ::self.dn_factor, ::self.dn_factor]
        return y


# ---------------------------------------------------------------------------
# Pure-jnp reference (PyTorch semantics) and self-test
# ---------------------------------------------------------------------------

def _reference(x, kernel, up_factor, dn_factor, pad):
    b, c, h, w = x.shape
    if up_factor != 1:
        f = up_factor
        x = x.reshape(b, c, h, 1, w, 1)
        x = jnp.pad(x, ((0, 0), (0, 0), (0, 0), (0, f - 1), (0, 0), (0, f - 1)))
        x = x.reshape(b, c, h * f, w * f)
    w_l, w_r, h_t, h_b = pad
    x = jnp.pad(x, ((0, 0), (0, 0), (h_t, h_b), (w_l, w_r)))
    kh, kw = kernel.shape
    Hp, Wp = x.shape[2], x.shape[3]
    Ho, Wo = Hp - kh + 1, Wp - kw + 1
    acc = jnp.zeros((b, c, Ho, Wo), jnp.float32)
    for i in range(kh):
        for j in range(kw):
            acc = acc + kernel[i, j] * x[:, :, i:i + Ho, j:j + Wo]
    if dn_factor != 1:
        acc = acc[:, :, ::dn_factor, ::dn_factor]
    return acc


if __name__ == "__main__":
    key = jax.random.PRNGKey(0)
    B, C, H, W = 2, 4, 16, 16
    x = jax.random.normal(key, (B, C, H, W), dtype=jnp.float32)

    # Separable FIR: normalized outer product of [1, 3, 3, 1].
    k1d = np.array([1.0, 3.0, 3.0, 1.0])
    k_sep = np.outer(k1d, k1d)
    k_sep = k_sep / k_sep.sum()
    # Non-separable 3x3 FIR (exercises the generic tap path).
    k_full = np.array([[1.0, 2.0, 1.0],
                       [0.0, 1.0, 0.0],
                       [1.0, 0.0, 2.0]])
    k_full = k_full / k_full.sum()

    cases = [
        (k_sep, dict(up_factor=2, dn_factor=1)),   # upsample-by-2 + FIR
        (k_sep, dict(up_factor=1, dn_factor=2)),   # FIR + downsample-by-2
        (k_sep, dict(up_factor=1, dn_factor=1)),   # plain "same"-ish FIR
        (k_full, dict(up_factor=1, dn_factor=1)),  # non-separable FIR
    ]

    for k2d, cfg in cases:
        mod = UpFirDn2D(k2d, channels=C, **cfg)
        y = jax.block_until_ready(mod(x))
        y_ref = _reference(x, jnp.asarray(k2d, jnp.float32),
                           cfg["up_factor"], cfg["dn_factor"], mod.pad)
        assert y.shape == y_ref.shape, (y.shape, y_ref.shape)
        assert jnp.allclose(y, y_ref, atol=1e-4, rtol=1e-4), (
            cfg, float(jnp.max(jnp.abs(y - y_ref))))

    print("KERNEL_OK")
</pallas_src>

<mosaic_0001>
module attributes {stable_mosaic.version = 11 : i64} {
  func.func @_fir_sep_kernel(%arg0: i32, %arg1: memref<4x32x32xf32, #tpu.memory_space<vmem>>, %arg2: memref<4x32x32xf32, #tpu.memory_space<vmem>>, %arg3: memref<4x35x35xf32, #tpu.memory_space<vmem>>, %arg4: memref<4x35x32xf32, #tpu.memory_space<vmem>>) attributes {dimension_semantics = [#tpu.dimension_semantics<parallel>], iteration_bounds = array<i64: 2>, scalar_prefetch = 0 : i64, scratch_operands = 2 : i64, tpu.core_type = #tpu.core_type<tc>, window_params = [{transform_indices = @transform_0, window_bounds = array<i64: 4, 32, 32>}, {transform_indices = @transform_1, window_bounds = array<i64: 4, 32, 32>}]} {
    %cst = arith.constant 0.000000e+00 : f32
    %0 = vector.broadcast %cst : f32 to vector<4x2x35xf32>
    %c0 = arith.constant 0 : index
    %c0_0 = arith.constant 0 : index
    %c0_1 = arith.constant 0 : index
    %1 = vector.load %arg3[%c0, %c0_0, %c0_1] : memref<4x35x35xf32, #tpu.memory_space<vmem>>, vector<4x2x35xf32>
    tpu.vector_store %arg3[%c0, %c0_0, %c0_1], %0 {strides = array<i32>} : memref<4x35x35xf32, #tpu.memory_space<vmem>>, vector<4x2x35xf32>,
    %cst_2 = arith.constant 0.000000e+00 : f32
    %2 = vector.broadcast %cst_2 : f32 to vector<4x1x35xf32>
    %c0_3 = arith.constant 0 : index
    %c34 = arith.constant 34 : index
    %c0_4 = arith.constant 0 : index
    %3 = vector.load %arg3[%c0_3, %c34, %c0_4] : memref<4x35x35xf32, #tpu.memory_space<vmem>>, vector<4x1x35xf32>
    tpu.vector_store %arg3[%c0_3, %c34, %c0_4], %2 {strides = array<i32>} : memref<4x35x35xf32, #tpu.memory_space<vmem>>, vector<4x1x35xf32>,
    %cst_5 = arith.constant 0.000000e+00 : f32
    %4 = vector.broadcast %cst_5 : f32 to vector<4x32x2xf32>
    %c0_6 = arith.constant 0 : index
    %c2 = arith.constant 2 : index
    %c0_7 = arith.constant 0 : index
    %5 = vector.load %arg3[%c0_6, %c2, %c0_7] : memref<4x35x35xf32, #tpu.memory_space<vmem>>, vector<4x32x2xf32>
    tpu.vector_store %arg3[%c0_6, %c2, %c0_7], %4 {strides = array<i32>} : memref<4x35x35xf32, #tpu.memory_space<vmem>>, vector<4x32x2xf32>,
    %cst_8 = arith.constant 0.000000e+00 : f32
    %6 = vector.broadcast %cst_8 : f32 to vector<4x32x1xf32>
    %c0_9 = arith.constant 0 : index
    %c2_10 = arith.constant 2 : index
    %c34_11 = arith.constant 34 : index
    %7 = vector.load %arg3[%c0_9, %c2_10, %c34_11] : memref<4x35x35xf32, #tpu.memory_space<vmem>>, vector<4x32x1xf32>
    tpu.vector_store %arg3[%c0_9, %c2_10, %c34_11], %6 {strides = array<i32>} : memref<4x35x35xf32, #tpu.memory_space<vmem>>, vector<4x32x1xf32>,
    %c0_12 = arith.constant 0 : index
    %c0_13 = arith.constant 0 : index
    %c0_14 = arith.constant 0 : index
    %8 = vector.load %arg1[%c0_12, %c0_13, %c0_14] : memref<4x32x32xf32, #tpu.memory_space<vmem>>, vector<4x32x32xf32>
    %c0_15 = arith.constant 0 : index
    %c2_16 = arith.constant 2 : index
    %c2_17 = arith.constant 2 : index
    %9 = vector.load %arg3[%c0_15, %c2_16, %c2_17] : memref<4x35x35xf32, #tpu.memory_space<vmem>>, vector<4x32x32xf32>
    tpu.vector_store %arg3[%c0_15, %c2_16, %c2_17], %8 {strides = array<i32>} : memref<4x35x35xf32, #tpu.memory_space<vmem>>, vector<4x32x32xf32>,
    %c0_18 = arith.constant 0 : index
    %c0_19 = arith.constant 0 : index
    %c0_20 = arith.constant 0 : index
    %10 = vector.load %arg3[%c0_18, %c0_19, %c0_20] : memref<4x35x35xf32, #tpu.memory_space<vmem>>, vector<4x35x32xf32>
    %cst_21 = arith.constant -0.223606795 : f32
    %11 = vector.broadcast %cst_21 : f32 to vector<4x35x32xf32>
    %12 = arith.mulf %11, %10 : vector<4x35x32xf32>
    %c0_22 = arith.constant 0 : index
    %c0_23 = arith.constant 0 : index
    %c1 = arith.constant 1 : index
    %13 = vector.load %arg3[%c0_22, %c0_23, %c1] : memref<4x35x35xf32, #tpu.memory_space<vmem>>, vector<4x35x32xf32>
    %cst_24 = arith.constant -0.670820415 : f32
    %14 = vector.broadcast %cst_24 : f32 to vector<4x35x32xf32>
    %15 = arith.mulf %14, %13 : vector<4x35x32xf32>
    %16 = arith.addf %12, %15 : vector<4x35x32xf32>
    %c0_25 = arith.constant 0 : index
    %c0_26 = arith.constant 0 : index
    %c2_27 = arith.constant 2 : index
    %17 = vector.load %arg3[%c0_25, %c0_26, %c2_27] : memref<4x35x35xf32, #tpu.memory_space<vmem>>, vector<4x35x32xf32>
    %cst_28 = arith.constant -0.670820415 : f32
    %18 = vector.broadcast %cst_28 : f32 to vector<4x35x32xf32>
    %19 = arith.mulf %18, %17 : vector<4x35x32xf32>
    %20 = arith.addf %16, %19 : vector<4x35x32xf32>
    %c0_29 = arith.constant 0 : index
    %c0_30 = arith.constant 0 : index
    %c3 = arith.constant 3 : index
    %21 = vector.load %arg3[%c0_29, %c0_30, %c3] : memref<4x35x35xf32, #tpu.memory_space<vmem>>, vector<4x35x32xf32>
    %cst_31 = arith.constant -0.223606795 : f32
    %22 = vector.broadcast %cst_31 : f32 to vector<4x35x32xf32>
    %23 = arith.mulf %22, %21 : vector<4x35x32xf32>
    %24 = arith.addf %20, %23 : vector<4x35x32xf32>
    %c0_32 = arith.constant 0 : index
    %c0_33 = arith.constant 0 : index
    %c0_34 = arith.constant 0 : index
    %25 = vector.load %arg4[%c0_32, %c0_33, %c0_34] : memref<4x35x32xf32, #tpu.memory_space<vmem>>, vector<4x35x32xf32>
    tpu.vector_store %arg4[%c0_32, %c0_33, %c0_34], %24 {strides = array<i32>} : memref<4x35x32xf32, #tpu.memory_space<vmem>>, vector<4x35x32xf32>,
    %c0_35 = arith.constant 0 : index
    %c0_36 = arith.constant 0 : index
    %c0_37 = arith.constant 0 : index
    %26 = vector.load %arg4[%c0_35, %c0_36, %c0_37] : memref<4x35x32xf32, #tpu.memory_space<vmem>>, vector<4x32x32xf32>
    %cst_38 = arith.constant -0.0698771253 : f32
    %27 = vector.broadcast %cst_38 : f32 to vector<4x32x32xf32>
    %28 = arith.mulf %27, %26 : vector<4x32x32xf32>
    %c0_39 = arith.constant 0 : index
    %c1_40 = arith.constant 1 : index
    %c0_41 = arith.constant 0 : index
    %29 = vector.load %arg4[%c0_39, %c1_40, %c0_41] : memref<4x35x32xf32, #tpu.memory_space<vmem>>, vector<4x32x32xf32>
    %cst_42 = arith.constant -0.209631369 : f32
    %30 = vector.broadcast %cst_42 : f32 to vector<4x32x32xf32>
    %31 = arith.mulf %30, %29 : vector<4x32x32xf32>
    %32 = arith.addf %28, %31 : vector<4x32x32xf32>
    %c0_43 = arith.constant 0 : index
    %c2_44 = arith.constant 2 : index
    %c0_45 = arith.constant 0 : index
    %33 = vector.load %arg4[%c0_43, %c2_44, %c0_45] : memref<4x35x32xf32, #tpu.memory_space<vmem>>, vector<4x32x32xf32>
    %cst_46 = arith.constant -0.209631369 : f32
    %34 = vector.broadcast %cst_46 : f32 to vector<4x32x32xf32>
    %35 = arith.mulf %34, %33 : vector<4x32x32xf32>
    %36 = arith.addf %32, %35 : vector<4x32x32xf32>
    %c0_47 = arith.constant 0 : index
    %c3_48 = arith.constant 3 : index
    %c0_49 = arith.constant 0 : index
    %37 = vector.load %arg4[%c0_47, %c3_48, %c0_49] : memref<4x35x32xf32, #tpu.memory_space<vmem>>, vector<4x32x32xf32>
    %cst_50 = arith.constant -0.0698771253 : f32
    %38 = vector.broadcast %cst_50 : f32 to vector<4x32x32xf32>
    %39 = arith.mulf %38, %37 : vector<4x32x32xf32>
    %40 = arith.addf %36, %39 : vector<4x32x32xf32>
    %c0_51 = arith.constant 0 : index
    %c0_52 = arith.constant 0 : index
    %c0_53 = arith.constant 0 : index
    %41 = vector.load %arg2[%c0_51, %c0_52, %c0_53] : memref<4x32x32xf32, #tpu.memory_space<vmem>>, vector<4x32x32xf32>
    tpu.vector_store %arg2[%c0_51, %c0_52, %c0_53], %40 {strides = array<i32>} : memref<4x32x32xf32, #tpu.memory_space<vmem>>, vector<4x32x32xf32>,
    return
  }
  func.func @transform_0(%arg0: i32) -> (i32, i32, i32) {
    %c0_i32 = arith.constant 0 : i32
    %c0_i32_0 = arith.constant 0 : i32
    %c0_i32_1 = arith.constant 0 : i32
    return %arg0, %c0_i32, %c0_i32_0 : i32, i32, i32
  }
  func.func @transform_1(%arg0: i32) -> (i32, i32, i32) {
    %c0_i32 = arith.constant 0 : i32
    %c0_i32_0 = arith.constant 0 : i32
    %c0_i32_1 = arith.constant 0 : i32
    return %arg0, %c0_i32, %c0_i32_0 : i32, i32, i32
  }
}

</mosaic_0001>

<bundles_post_ra>
// kernel: tpu_custom_call.1
= control target key start
LH: loop header
LB: loop body
LE: loop exit
PB: predicated region body
PF: predicated region fallthrough
CT: control target
= control target key end

     0   :  { %6 = vsyncpa [#allocation5], 0  ;;  %s1641_s0 = inlined_call_operand.hbm [shape: f32[8,32,32], index: 0, kind: input, shape index: {}]   ;;  %s1642_s1 = inlined_call_operand.hbm [shape: f32[8,32,32], index: 1, kind: output, shape index: {}]  }
   0x1   :  { %8 = vsyncpa [#allocation5 + $0x1], 0 }
   0x2   :  { %9 = vsyncpa [#allocation6], 0 }
   0x3   :  { %11 = vsyncpa [#allocation6 + $0x1], 0  ;;  %s1117_s6 = smov 0   ;;  %s1119_s7 = smov 0  }
   0x4   :  { %s1121_s8 = smov 0   ;;  %s1123_s9 = smov 0  }
   0x5 LB: > { %s1138_s10 = sadd.s32 4294967295, %s1096_s9   ;;  %s925_s11 = sadd.s32 4294967294, %s1096_s9   ;;  %s1096_s9 = sphi %s1123_s9, %s1652_s9   ;;  %s1092_s8 = sphi %s1121_s8, %s1651_s8   ;;  %s1088_s7 = sphi %s1119_s7, %s1650_s7   ;;  %s1084_s6 = sphi %s1117_s6, %s1649_s6  }
   0x6   : > { %s1142_s12 = sadd.s32 1, %s1096_s9   ;;  %s24_s13 = sadd.s32 1, %s1092_s8 }
   0x7   : > { %s21_s14 = ssub.s32 %s1096_s9, %s1142_s12  ;;  %p31_p0 = scmp.ne.s32.totalorder %s1092_s8, %s1088_s7 }
   0x8   : > { %p22_p1 = scmp.eq.s32.totalorder %s21_s14, 0  ;;  %p32_p2 = scmp.eq.s32.totalorder %s1096_s9, 0 }
   0x9   : > { %p37_p3 = scmp.ne.s32.totalorder %s1088_s7, %s1084_s6  ;;  %p38_p4 = scmp.eq.s32.totalorder %s1138_s10, 0 }
   0xa   : > { %s1154_s15 = scalar_select %p22_p1, %s1092_s8, %s24_s13  }
   0xb   : > { %p1156_p5 = por %p32_p2, %p31_p0  ;;  %p1160_p6 = por %p38_p4, %p37_p3 }
   0xc   : > { %p61_p7 = scmp.eq.s32.totalorder %s1138_s10, 1  ;;  %p67_p8 = scmp.eq.s32.totalorder %s925_s11, 1 }
   0xd   : > { %p957_p10 = scmp.lt.s32.totalorder %s1096_s9, 2  ;;  %s87_s20 = sand.u32 1, %s1092_s8  }
   0xe   : > { %p1167_p11 = por %p61_p7, %p31_p0  ;;  %p1171_p12 = por %p67_p8, %p37_p3 }
   0xf   : > { %s942_s21 = sshll.u32 %s1096_s9, 7  ;;  %s928_s22 = sshll.u32 %s87_s20, 7 }
  0x10   : > { %s97_s25 = scalar_lea.hbm %s1641_s0, %s942_s21  ;;  %s91_s27 = scalar_lea.vmem [#allocation4], %s928_s22 }
  0x11   : > { %s98_s26 = sshll.u32 %s97_s25, 4  ;;  %s100_s28 = sshll.u32 %s91_s27, 4  ;;  %s99_s26 = int_to_ptr.hbm [resolvable:$true] %s98_s26  ;;  %s101_s28 = int_to_ptr.vmem [resolvable:$true] %s100_s28 }
  0x12   : > { %p1182_p13 = pnand %p957_p10, %p1156_p5  ;;  %p932_p0 = scmp.ge.s32.totalorder %s1096_s9, 1 }
  0x13   : > { %p108_p1 = scmp.lt.s32.totalorder %s1096_s9, 3  ;;  %s88_s30 = scalar_lea.sflag [#allocation5], %s87_s20 }
  0x14   : > { %s1000_s2 = sshra.s32 %s99_s26, 4  ;;  %p1004_p3 = pneg %p1182_p13  ;;  %s1001_s2 = int_to_ptr.hbm [resolvable:$true] %s1000_s2 }
  0x15   : > { %s1002_s3 = scalar_lea.hbm %s1001_s2, 128  ;;  %s1007_s11 = scalar_lea.hbm %s1641_s0, 256 }
  0x16   : > { %p1003_p2 = scmp.ne.s32.totalorder %s1001_s2, %s1002_s3  ;;  %p1008_p5 = scmp.lt.s32.totalorder %s1001_s2, %s1641_s0 }
  0x17   : > { %p1009_p8 = scmp.lt.s32.totalorder %s1007_s11, %s1002_s3 }
  0x18   : > { %p1005_p4 = pnand %p1004_p3, %p1003_p2 }
  0x19   : > { %p1010_p10 = por %p1009_p8, %p1008_p5 }
  0x1a   : > { %p1006_p7 = pneg %p1005_p4 }
  0x1c   : > { %p1011_p9 = pnand %p1010_p10, %p1006_p7 }
  0x1e   : > { %1014 = shalt.err (!%p1011_p9)
}
  0x1f   : > { %s1098_s16 = smov 128   ;;  %s1099_s20 = smov 8  }
  0x20   : > { %952 = dma.hbm_to_vmem [thread:$0]  (!%p1182_p13), %s99_s26, 2048, %s101_s28, %s88_s30, %s1098_s16, %s1098_s16, %s1099_s20  }
  0x21   : > { %p109_p2 = pnand %p932_p0, %p108_p1 }
  0x22   : > { %s1203_s21 = sand.u32 (!%p109_p2), 1, %s1088_s7  }
  0x23   : > { %112 = sbr.rel (%p109_p2) target bundleno = 465 (0x1d1), region = 24  ;;  %s933_s22 = sshll.u32 (!%p109_p2), %s1203_s21, 7 }
  0x24   : > { %s115_s23 = scalar_lea.sflag (!%p109_p2), [#allocation5], %s1203_s21  ;;  %s1209_s24 = scalar_lea.vmem (!%p109_p2), [#allocation4], %s933_s22 }
  0x28   : > { %1075 = dma.done.wait (%p1160_p6), %s115_s23, 2048  }
  0x29   : > { %1077 = vsyncadd (%p1160_p6), %s115_s23, 4294965248  ;;  %v186_v0 = vld [vmem:[%s1209_s24 + $0x10] sm:$0xff]  ;;  %v184_v1 = vld [vmem:[%s1209_s24] sm:$0xff]  ;;  %s1100_s25 = smov 2   ;;  %vm150_vm0 = vcmask 15360   ;;  %vm167_vm1 = vcmask 285968  }
  0x2a   : > { %220 = vrot.lane.b32.xlu1 %v186_v0, %s1100_s25  ;;  %216 = vrot.lane.b32.xlu0 %v184_v1, %s1100_s25  ;;  %v188_v2 = vld [vmem:[%s1209_s24 + $0x20] sm:$0xff]  ;;  %v187_v3 = vld [vmem:[%s1209_s24 + $0x18] sm:$0xff]  ;;  %v1101_v6 = vmov 0.0   ;;  %vm140_vm2 = vcmask 279552   ;;  %vm264_vm3 = vcmask 277520   ;;  %vm145_vm4 = vcmask 278528  }
  0x2b   : > { %224 = vrot.lane.b32.xlu2 %v188_v2, %s1100_s25  ;;  %v185_v4 = vld [vmem:[%s1209_s24 + $0x8] sm:$0xff]  ;;  %153 = vst.msk [vmem:[#allocation2 + $0x12] sm:$0xff] %vm150_vm0, %v1101_v6  ;;  %v191_v7 = vld [vmem:[%s1209_s24 + $0x38] sm:$0xff]  ;;  %v190_v8 = vld [vmem:[%s1209_s24 + $0x30] sm:$0xff]  ;;  %s1102_s17 = smov 127   ;;  %s1103_s26 = smov 126  }
  0x2c   : > { %v189_v5 = vld [vmem:[%s1209_s24 + $0x28] sm:$0xff]  ;;  %170 = vst.msk [vmem:[#allocation2 + $0x12] sm:$0xff] %vm167_vm1, %v1101_v6  ;;  %v192_v9 = vld [vmem:[%s1209_s24 + $0x40] sm:$0xff]  ;;  %v194_v10 = vld [vmem:[%s1209_s24 + $0x50] sm:$0xff]  ;;  %s1104_s27 = smov 125   ;;  %vm621_vm5 = vcmask 261120  }
  0x2d   : > { %151 = vst.msk [vmem:[#allocation2 + $0x2] sm:$0xff] %vm150_vm0, %v1101_v6  ;;  %v193_v11 = vld [vmem:[%s1209_s24 + $0x48] sm:$0xff]  ;;  %v195_v12 = vld [vmem:[%s1209_s24 + $0x58] sm:$0xff]  ;;  %v196_v13 = vld [vmem:[%s1209_s24 + $0x60] sm:$0xff]  ;;  %vm626_vm6 = vcmask 256000   ;;  %s1547_s28 = scalar_lea.vmem [#allocation7], %s933_s22 }
  0x2e   : > { %152 = vst.msk [vmem:[#allocation2 + $0xa] sm:$0xff] %vm150_vm0, %v1101_v6  ;;  %v197_v14 = vld [vmem:[%s1209_s24 + $0x68] sm:$0xff]  ;;  %v198_v15 = vld [vmem:[%s1209_s24 + $0x70] sm:$0xff]  ;;  %v199_v16 = vld [vmem:[%s1209_s24 + $0x78] sm:$0xff]  ;;  %s944_s29 = sshll.u32 %s1138_s10, 7  ;;  %s849_s10 = sshll.u32 %s1547_s28, 4  ;;  %s850_s10 = int_to_ptr.vmem [resolvable:$true] %s849_s10 }
  0x2f   : > { %154 = vst.msk [vmem:[#allocation2 + $0x1a] sm:$0xff] %vm150_vm0, %v1101_v6  ;;  %s848_s3 = scalar_lea.hbm %s1642_s1, %s944_s29  ;;  %s836_s5 = scalar_lea.sflag [#allocation6], %s1203_s21 }
  0x30   : > { %155 = vst.msk [vmem:[#allocation2 + $0x2a] sm:$0xff] %vm150_vm0, %v1101_v6  ;;  %s851_s4 = sshll.u32 %s848_s3, 4  ;;  %s1050_s20 = scalar_lea.hbm %s1642_s1, 256  ;;  %s852_s4 = int_to_ptr.hbm [resolvable:$true] %s851_s4 }
  0x31   : > { %156 = vst.msk [vmem:[#allocation2 + $0x32] sm:$0xff] %vm150_vm0, %v1101_v6  ;;  %s1044_s11 = sshra.s32 %s852_s4, 4  ;;  %s1045_s11 = int_to_ptr.hbm [resolvable:$true] %s1044_s11 }
  0x32   : > { %222 = vrot.lane.b32.xlu1 %v187_v3, %s1100_s25  ;;  %218 = vrot.lane.b32.xlu0 %v185_v4, %s1100_s25  ;;  %157 = vst.msk [vmem:[#allocation2 + $0x3a] sm:$0xff] %vm150_vm0, %v1101_v6  ;;  %s1046_s13 = scalar_lea.hbm %s1045_s11, 128  ;;  %p1051_p0 = scmp.lt.s32.totalorder %s1045_s11, %s1642_s1 }
  0x33   : > { %226 = vrot.lane.b32.xlu2 %v189_v5, %s1100_s25  ;;  %158 = vst.msk [vmem:[#allocation2 + $0x42] sm:$0xff] %vm150_vm0, %v1101_v6  ;;  %p1047_p6 = scmp.ne.s32.totalorder %s1045_s11, %s1046_s13  ;;  %p1052_p1 = scmp.lt.s32.totalorder %s1050_s20, %s1046_s13 }
  0x34   : > { %159 = vst.msk [vmem:[#allocation2 + $0x52] sm:$0xff] %vm150_vm0, %v1101_v6 }
  0x35   : > { %160 = vst.msk [vmem:[#allocation2 + $0x5a] sm:$0xff] %vm150_vm0, %v1101_v6  ;;  %p1048_p9 = pnand %p1047_p6, %p1167_p11  ;;  %p1053_p3 = por %p1052_p1, %p1051_p0 }
  0x36   : > { %161 = vst.msk [vmem:[#allocation2 + $0x62] sm:$0xff] %vm150_vm0, %v1101_v6 }
  0x37   : > { %162 = vst.msk [vmem:[#allocation2 + $0x6a] sm:$0xff] %vm150_vm0, %v1101_v6  ;;  %p1049_p13 = pneg %p1048_p9 }
  0x38   : > { %163 = vst.msk [vmem:[#allocation2 + $0x7a] sm:$0xff] %vm150_vm0, %v1101_v6 }
  0x39   : > { %164 = vst.msk [vmem:[#allocation2 + $0x82] sm:$0xff] %vm150_vm0, %v1101_v6  ;;  %p1054_p4 = pnand %p1053_p3, %p1049_p13 }
  0x3a   : > { %230 = vrot.lane.b32.xlu1 %v191_v7, %s1100_s25  ;;  %228 = vrot.lane.b32.xlu0 %v190_v8, %s1100_s25  ;;  %165 = vst.msk [vmem:[#allocation2 + $0x8a] sm:$0xff] %vm150_vm0, %v1101_v6 }
  0x3b   : > { %232 = vrot.lane.b32.xlu2 %v192_v9, %s1100_s25  ;;  %166 = vst.msk [vmem:[#allocation2 + $0x92] sm:$0xff] %vm150_vm0, %v1101_v6 }
  0x3c   : > { %168 = vst.msk [vmem:[#allocation2 + $0x2] sm:$0xff] %vm167_vm1, %v1101_v6 }
  0x3d   : > { %169 = vst.msk [vmem:[#allocation2 + $0xa] sm:$0xff] %vm167_vm1, %v1101_v6 }
  0x3e   : > { %171 = vst.msk [vmem:[#allocation2 + $0x1a] sm:$0xff] %vm167_vm1, %v1101_v6 }
  0x3f   : > { %172 = vst.msk [vmem:[#allocation2 + $0x2a] sm:$0xff] %vm167_vm1, %v1101_v6 }
  0x40   : > { %173 = vst.msk [vmem:[#allocation2 + $0x32] sm:$0xff] %vm167_vm1, %v1101_v6 }
  0x41   : > { %174 = vst.msk [vmem:[#allocation2 + $0x3a] sm:$0xff] %vm167_vm1, %v1101_v6 }
  0x42   : > { %236 = vrot.lane.b32.xlu1 %v194_v10, %s1100_s25  ;;  %234 = vrot.lane.b32.xlu0 %v193_v11, %s1100_s25  ;;  %175 = vst.msk [vmem:[#allocation2 + $0x42] sm:$0xff] %vm167_vm1, %v1101_v6 }
  0x43   : > { %238 = vrot.lane.b32.xlu2 %v195_v12, %s1100_s25  ;;  %176 = vst.msk [vmem:[#allocation2 + $0x52] sm:$0xff] %vm167_vm1, %v1101_v6 }
  0x44   : > { %177 = vst.msk [vmem:[#allocation2 + $0x5a] sm:$0xff] %vm167_vm1, %v1101_v6 }
  0x45   : > { %178 = vst.msk [vmem:[#allocation2 + $0x62] sm:$0xff] %vm167_vm1, %v1101_v6 }
  0x46   : > { %179 = vst.msk [vmem:[#allocation2 + $0x6a] sm:$0xff] %vm167_vm1, %v1101_v6 }
  0x47   : > { %180 = vst.msk [vmem:[#allocation2 + $0x7a] sm:$0xff] %vm167_vm1, %v1101_v6 }
  0x48   : > { %181 = vst.msk [vmem:[#allocation2 + $0x82] sm:$0xff] %vm167_vm1, %v1101_v6 }
  0x49   : > { %182 = vst.msk [vmem:[#allocation2 + $0x8a] sm:$0xff] %vm167_vm1, %v1101_v6 }
  0x4a   : > { %240 = vrot.lane.b32.xlu0 %v196_v13, %s1100_s25  ;;  %242 = vrot.lane.b32.xlu1 %v197_v14, %s1100_s25  ;;  %183 = vst.msk [vmem:[#allocation2 + $0x92] sm:$0xff] %vm167_vm1, %v1101_v6 }
  0x4b   : > { %244 = vrot.lane.b32.xlu2 %v198_v15, %s1100_s25  ;;  %141 = vst.msk [vmem:[#allocation2] sm:$0x3] %vm140_vm2, %v1101_v6 }
  0x4c   : > { %142 = vst.msk [vmem:[#allocation2 + $0x28] sm:$0x3] %vm140_vm2, %v1101_v6 }
  0x4d   : > { %143 = vst.msk [vmem:[#allocation2 + $0x50] sm:$0x3] %vm140_vm2, %v1101_v6 }
  0x4e   : > { %144 = vst.msk [vmem:[#allocation2 + $0x78] sm:$0x3] %vm140_vm2, %v1101_v6 }
  0x4f   : > { %146 = vst.msk [vmem:[#allocation2 + $0x22] sm:$0x1] %vm145_vm4, %v1101_v6 }
  0x50   : > { %147 = vst.msk [vmem:[#allocation2 + $0x4a] sm:$0x1] %vm145_vm4, %v1101_v6 }
  0x51   : > { %148 = vst.msk [vmem:[#allocation2 + $0x72] sm:$0x1] %vm145_vm4, %v1101_v6 }
  0x52   : > { %246 = vrot.lane.b32.xlu0 %v199_v16, %s1100_s25  ;;  %149 = vst.msk [vmem:[#allocation2 + $0x9a] sm:$0x1] %vm145_vm4, %v1101_v6 }
  0x85   : > { %v225_v17 = vpop.permute.xlu2 %224 }
  0x86   : > { %269 = vst.msk [vmem:[#allocation2 + $0x2a] sm:$0xff] %vm264_vm3, %v225_v17 }
  0x8d   : > { %v227_v18 = vpop.permute.xlu2 %226  ;;  %v1360_v37 = vld [vmem:[#allocation2 + $0x28] sm:$0xff] }
  0x8e   : > { %270 = vst.msk [vmem:[#allocation2 + $0x32] sm:$0xff] %vm264_vm3, %v227_v18  ;;  %v326_v40 = vmul.f32 -0.6708204, %v1360_v37 }
  0x95   : > { %v233_v19 = vpop.permute.xlu2 %232  ;;  %v1362_v38 = vld [vmem:[#allocation2 + $0x30] sm:$0xff] }
  0x96   : > { %273 = vst.msk [vmem:[#allocation2 + $0x52] sm:$0xff] %vm264_vm3, %v233_v19  ;;  %v327_v43 = vmul.f32 -0.6708204, %v1362_v38 }
  0x9c   : > { %v221_v20 = vpop.permute.xlu1 %220  ;;  %v217_v21 = vpop.permute.xlu0 %216 }
  0x9d   : > { %267 = vst.msk [vmem:[#allocation2 + $0x12] sm:$0xff] %vm264_vm3, %v221_v20  ;;  %v239_v22 = vpop.permute.xlu2 %238  ;;  %v1386_v52 = vld [vmem:[#allocation2 + $0x50] sm:$0xff] }
  0x9e   : > { %265 = vst.msk [vmem:[#allocation2 + $0x2] sm:$0xff] %vm264_vm3, %v217_v21  ;;  %v331_v55 = vmul.f32 -0.6708204, %v1386_v52 }
  0x9f   : > { %276 = vst.msk [vmem:[#allocation2 + $0x6a] sm:$0xff] %vm264_vm3, %v239_v22 }
  0xa4   : > { %v223_v23 = vpop.permute.xlu1 %222  ;;  %v219_v24 = vpop.permute.xlu0 %218 }
  0xa5   : > { %268 = vst.msk [vmem:[#allocation2 + $0x1a] sm:$0xff] %vm264_vm3, %v223_v23  ;;  %v1326_v25 = vld [vmem:[#allocation2] sm:$0xff]  ;;  %v245_v27 = vpop.permute.xlu2 %244  ;;  %v306_v23 = vmul.f32 -0.2236068, %v1360_v37 }
  0xa6   : > { %266 = vst.msk [vmem:[#allocation2 + $0xa] sm:$0xff] %vm264_vm3, %v219_v24  ;;  %v1330_v26 = vmul.f32 -0.6708204, %v1326_v25  ;;  %v1401_v60 = vld [vmem:[#allocation2 + $0x70] sm:$0x7] }
  0xa7   : > { %279 = vst.msk [vmem:[#allocation2 + $0x8a] sm:$0xff] %vm264_vm3, %v245_v27  ;;  %v335_v63 = vmul.f32 -0.6708204, %v1401_v60  ;;  %v301_v15 = vmul.f32 -0.2236068, %v1326_v25 }
  0xa8   : > { %361 = vrot.lane.b32.xlu1 %v1330_v26, %s1102_s17  ;;  %v311_v24 = vmul.f32 -0.2236068, %v1386_v52 }
  0xac   : > { %v1335_v28 = vld [vmem:[#allocation2 + $0x18] sm:$0xff]  ;;  %v231_v29 = vpop.permute.xlu1 %230  ;;  %v229_v30 = vpop.permute.xlu0 %228  ;;  %v1358_v36 = vld [vmem:[#allocation2 + $0x20] sm:$0x7] }
  0xad   : > { %v1337_v31 = vld [vmem:[#allocation2 + $0x10] sm:$0xff]  ;;  %v1339_v32 = vld [vmem:[#allocation2 + $0x8] sm:$0xff]  ;;  %v1342_v33 = vmul.f32 -0.6708204, %v1335_v28  ;;  %272 = vst.msk [vmem:[#allocation2 + $0x42] sm:$0xff] %vm264_vm3, %v231_v29 }
  0xae   : > { %v1346_v34 = vmul.f32 -0.6708204, %v1337_v31  ;;  %v1349_v35 = vmul.f32 -0.6708204, %v1339_v32  ;;  %271 = vst.msk [vmem:[#allocation2 + $0x3a] sm:$0xff] %vm264_vm3, %v229_v30 }
  0xaf   : > { %v325_v39 = vmul.f32 -0.6708204, %v1358_v36  ;;  %v302_v9 = vmul.f32 -0.2236068, %v1339_v32  ;;  %v305_v12 = vmul.f32 -0.2236068, %v1358_v36 }
  0xb0   : > { %365 = vrot.lane.b32.xlu0 %v1346_v34, %s1102_s17  ;;  %363 = vrot.lane.b32.xlu2 %v1349_v35, %s1102_s17  ;;  %v303_v16 = vmul.f32 -0.2236068, %v1337_v31  ;;  %v304_v22 = vmul.f32 -0.2236068, %v1335_v28  ;;  %v307_v28 = vmul.f32 -0.2236068, %v1362_v38 }
  0xb1   : > { %367 = vrot.lane.b32.xlu1 %v1342_v33, %s1102_s17 }
  0xb4   : > { %v237_v41 = vpop.permute.xlu1 %236  ;;  %v235_v42 = vpop.permute.xlu0 %234  ;;  %v1376_v46 = vld [vmem:[#allocation2 + $0x48] sm:$0x7] }
  0xb5   : > { %275 = vst.msk [vmem:[#allocation2 + $0x62] sm:$0xff] %vm264_vm3, %v237_v41  ;;  %v1372_v44 = vld [vmem:[#allocation2 + $0x38] sm:$0xff]  ;;  %v1374_v45 = vld [vmem:[#allocation2 + $0x40] sm:$0xff]  ;;  %v330_v51 = vmul.f32 -0.6708204, %v1376_v46 }
  0xb6   : > { %274 = vst.msk [vmem:[#allocation2 + $0x5a] sm:$0xff] %vm264_vm3, %v235_v42  ;;  %v328_v47 = vmul.f32 -0.6708204, %v1372_v44  ;;  %v329_v48 = vmul.f32 -0.6708204, %v1374_v45 }
  0xb7   : > { %v308_v17 = vmul.f32 -0.2236068, %v1372_v44  ;;  %v309_v32 = vmul.f32 -0.2236068, %v1374_v45  ;;  %v310_v38 = vmul.f32 -0.2236068, %v1376_v46 }
  0xb8   : > { %369 = vrot.lane.b32.xlu2 %v325_v39, %s1102_s17  ;;  %371 = vrot.lane.b32.xlu0 %v326_v40, %s1102_s17 }
  0xb9   : > { %373 = vrot.lane.b32.xlu1 %v327_v43, %s1102_s17 }
  0xbc   : > { %v241_v49 = vpop.permute.xlu0 %240  ;;  %v243_v50 = vpop.permute.xlu1 %242  ;;  %v1399_v59 = vld [vmem:[#allocation2 + $0x68] sm:$0xff] }
  0xbd   : > { %277 = vst.msk [vmem:[#allocation2 + $0x7a] sm:$0xff] %vm264_vm3, %v241_v49  ;;  %v1388_v53 = vld [vmem:[#allocation2 + $0x58] sm:$0xff]  ;;  %v1390_v54 = vld [vmem:[#allocation2 + $0x60] sm:$0xff]  ;;  %v334_v62 = vmul.f32 -0.6708204, %v1399_v59 }
  0xbe   : > { %278 = vst.msk [vmem:[#allocation2 + $0x82] sm:$0xff] %vm264_vm3, %v243_v50  ;;  %v332_v56 = vmul.f32 -0.6708204, %v1388_v53  ;;  %v333_v58 = vmul.f32 -0.6708204, %v1390_v54 }
  0xbf   : > { %v312_v41 = vmul.f32 -0.2236068, %v1388_v53  ;;  %v313_v46 = vmul.f32 -0.2236068, %v1390_v54  ;;  %v315_v50 = vmul.f32 -0.2236068, %v1401_v60 }
  0xc0   : > { %375 = vrot.lane.b32.xlu2 %v328_v47, %s1102_s17  ;;  %377 = vrot.lane.b32.xlu0 %v329_v48, %s1102_s17 }
  0xc1   : > { %379 = vrot.lane.b32.xlu1 %v330_v51, %s1102_s17 }
  0xc4   : > { %v247_v57 = vpop.permute.xlu0 %246  ;;  %v1403_v61 = vld [vmem:[#allocation2 + $0x78] sm:$0xff] }
  0xc5   : > { %280 = vst.msk [vmem:[#allocation2 + $0x92] sm:$0xff] %vm264_vm3, %v247_v57  ;;  %v336_v0 = vmul.f32 -0.6708204, %v1403_v61  ;;  %v1411_v1 = vld [vmem:[#allocation2 + $0x80] sm:$0xff]  ;;  %v1413_v2 = vld [vmem:[#allocation2 + $0x88] sm:$0xff] }
  0xc6   : > { %v337_v4 = vmul.f32 -0.6708204, %v1411_v1  ;;  %v338_v5 = vmul.f32 -0.6708204, %v1413_v2  ;;  %v317_v42 = vmul.f32 -0.2236068, %v1411_v1 }
  0xc7   : > { %v316_v54 = vmul.f32 -0.2236068, %v1403_v61 }
  0xc8   : > { %381 = vrot.lane.b32.xlu2 %v331_v55, %s1102_s17  ;;  %383 = vrot.lane.b32.xlu0 %v332_v56, %s1102_s17 }
  0xc9   : > { %385 = vrot.lane.b32.xlu1 %v333_v58, %s1102_s17 }
  0xcc   : > { %v1415_v3 = vld [vmem:[#allocation2 + $0x90] sm:$0xff]  ;;  %v1423_v7 = vld [vmem:[#allocation2 + $0x98] sm:$0x7] }
  0xcd   : > { %v339_v6 = vmul.f32 -0.6708204, %v1415_v3  ;;  %v340_v8 = vmul.f32 -0.6708204, %v1423_v7 }
  0xd0   : > { %387 = vrot.lane.b32.xlu2 %v334_v62, %s1102_s17  ;;  %389 = vrot.lane.b32.xlu0 %v335_v63, %s1102_s17 }
  0xd1   : > { %391 = vrot.lane.b32.xlu1 %v336_v0, %s1102_s17 }
  0xd8   : > { %393 = vrot.lane.b32.xlu2 %v337_v4, %s1102_s17  ;;  %395 = vrot.lane.b32.xlu0 %v338_v5, %s1102_s17 }
  0xd9   : > { %397 = vrot.lane.b32.xlu1 %v339_v6, %s1102_s17 }
  0xe0   : > { %399 = vrot.lane.b32.xlu2 %v340_v8, %s1102_s17  ;;  %441 = vrot.lane.b32.xlu0 %v1330_v26, %s1103_s26 }
  0xe1   : > { %443 = vrot.lane.b32.xlu1 %v1349_v35, %s1103_s26 }
  0xe8   : > { %445 = vrot.lane.b32.xlu2 %v1346_v34, %s1103_s26  ;;  %447 = vrot.lane.b32.xlu0 %v1342_v33, %s1103_s26  ;;  %v314_v33 = vmul.f32 -0.2236068, %v1399_v59  ;;  %v318_v59 = vmul.f32 -0.2236068, %v1413_v2 }
  0xe9   : > { %449 = vrot.lane.b32.xlu1 %v325_v39, %s1103_s26 }
  0xf0   : > { %451 = vrot.lane.b32.xlu2 %v326_v40, %s1103_s26  ;;  %453 = vrot.lane.b32.xlu0 %v327_v43, %s1103_s26 }
  0xf1   : > { %455 = vrot.lane.b32.xlu1 %v328_v47, %s1103_s26 }
  0xf8   : > { %457 = vrot.lane.b32.xlu2 %v329_v48, %s1103_s26  ;;  %459 = vrot.lane.b32.xlu0 %v330_v51, %s1103_s26  ;;  %v320_v51 = vmul.f32 -0.2236068, %v1423_v7 }
  0xf9   : > { %461 = vrot.lane.b32.xlu1 %v331_v55, %s1103_s26 }
 0x100   : > { %463 = vrot.lane.b32.xlu2 %v332_v56, %s1103_s26  ;;  %465 = vrot.lane.b32.xlu0 %v333_v58, %s1103_s26 }
 0x101   : > { %467 = vrot.lane.b32.xlu1 %v334_v62, %s1103_s26 }
 0x108   : > { %469 = vrot.lane.b32.xlu2 %v335_v63, %s1103_s26  ;;  %471 = vrot.lane.b32.xlu0 %v336_v0, %s1103_s26 }
 0x109   : > { %473 = vrot.lane.b32.xlu1 %v337_v4, %s1103_s26 }
 0x10a   : > { %v364_v10 = vpop.permute.xlu2 %363 }
 0x10b   : > { %v1432_v11 = vadd.f32 %v364_v10, %v302_v9 }
 0x110   : > { %475 = vrot.lane.b32.xlu2 %v338_v5, %s1103_s26  ;;  %477 = vrot.lane.b32.xlu0 %v339_v6, %s1103_s26  ;;  %v319_v5 = vmul.f32 -0.2236068, %v1415_v3 }
 0x111   : > { %479 = vrot.lane.b32.xlu1 %v340_v8, %s1103_s26 }
 0x112   : > { %v370_v13 = vpop.permute.xlu2 %369 }
 0x113   : > { %v1435_v14 = vadd.f32 %v370_v13, %v305_v12 }
 0x118   : > { %543 = vrot.lane.b32.xlu0 %v302_v9, %s1104_s27  ;;  %541 = vrot.lane.b32.xlu2 %v301_v15, %s1104_s27 }
 0x119   : > { %545 = vrot.lane.b32.xlu1 %v303_v16, %s1104_s27 }
 0x11a   : > { %v376_v18 = vpop.permute.xlu2 %375  ;;  %v362_v19 = vpop.permute.xlu1 %361 }
 0x11b   : > { %v1443_v20 = vadd.f32 %v376_v18, %v308_v17  ;;  %v1445_v21 = vadd.f32 %v362_v19, %v301_v15 }
 0x120   : > { %549 = vrot.lane.b32.xlu0 %v305_v12, %s1104_s27  ;;  %547 = vrot.lane.b32.xlu2 %v304_v22, %s1104_s27 }
 0x121   : > { %551 = vrot.lane.b32.xlu1 %v306_v23, %s1104_s27 }
 0x122   : > { %v366_v25 = vpop.permute.xlu0 %365  ;;  %v382_v26 = vpop.permute.xlu2 %381 }
 0x123   : > { %v423_v27 = vadd.f32 %v366_v25, %v303_v16  ;;  %v1453_v29 = vadd.f32 %v382_v26, %v311_v24  ;;  %v368_v30 = vpop.permute.xlu1 %367 }
 0x124   : > { %v1455_v31 = vadd.f32 %v368_v30, %v304_v22 }
 0x128   : > { %555 = vrot.lane.b32.xlu0 %v308_v17, %s1104_s27  ;;  %553 = vrot.lane.b32.xlu2 %v307_v28, %s1104_s27 }
 0x129   : > { %557 = vrot.lane.b32.xlu1 %v309_v32, %s1104_s27 }
 0x12a   : > { %v388_v34 = vpop.permute.xlu2 %387  ;;  %v372_v35 = vpop.permute.xlu0 %371 }
 0x12b   : > { %v1463_v36 = vadd.f32 %v388_v34, %v314_v33  ;;  %v426_v37 = vadd.f32 %v372_v35, %v306_v23  ;;  %v374_v39 = vpop.permute.xlu1 %373 }
 0x12c   : > { %v1465_v40 = vadd.f32 %v374_v39, %v307_v28 }
 0x130   : > { %561 = vrot.lane.b32.xlu0 %v311_v24, %s1104_s27  ;;  %559 = vrot.lane.b32.xlu2 %v310_v38, %s1104_s27 }
 0x131   : > { %563 = vrot.lane.b32.xlu1 %v312_v41, %s1104_s27 }
 0x132   : > { %v394_v43 = vpop.permute.xlu2 %393  ;;  %v378_v44 = vpop.permute.xlu0 %377 }
 0x133   : > { %v1473_v45 = vadd.f32 %v394_v43, %v317_v42  ;;  %v429_v47 = vadd.f32 %v378_v44, %v309_v32  ;;  %v380_v48 = vpop.permute.xlu1 %379 }
 0x134   : > { %v1475_v49 = vadd.f32 %v380_v48, %v310_v38 }
 0x138   : > { %567 = vrot.lane.b32.xlu0 %v314_v33, %s1104_s27  ;;  %565 = vrot.lane.b32.xlu2 %v313_v46, %s1104_s27 }
 0x139   : > { %569 = vrot.lane.b32.xlu1 %v315_v50, %s1104_s27 }
 0x13a   : > { %v400_v52 = vpop.permute.xlu2 %399  ;;  %v384_v53 = vpop.permute.xlu0 %383 }
 0x13b   : > { %v1483_v55 = vadd.f32 %v400_v52, %v320_v51  ;;  %v432_v56 = vadd.f32 %v384_v53, %v312_v41  ;;  %v386_v57 = vpop.permute.xlu1 %385 }
 0x13c   : > { %v1485_v58 = vadd.f32 %v386_v57, %v313_v46 }
 0x140   : > { %573 = vrot.lane.b32.xlu0 %v317_v42, %s1104_s27  ;;  %571 = vrot.lane.b32.xlu2 %v316_v54, %s1104_s27 }
 0x141   : > { %575 = vrot.lane.b32.xlu1 %v318_v59, %s1104_s27 }
 0x142   : > { %v446_v60 = vpop.permute.xlu2 %445  ;;  %v390_v62 = vpop.permute.xlu0 %389 }
 0x143   : > { %v503_v63 = vadd.f32 %v446_v60, %v423_v27  ;;  %v435_v0 = vadd.f32 %v390_v62, %v315_v50  ;;  %v392_v1 = vpop.permute.xlu1 %391 }
 0x144   : > { %v1492_v4 = vadd.f32 %v392_v1, %v316_v54 }
 0x148   : > { %579 = vrot.lane.b32.xlu0 %v320_v51, %s1104_s27  ;;  %577 = vrot.lane.b32.xlu2 %v319_v5, %s1104_s27 }
 0x14a   : > { %v452_v61 = vpop.permute.xlu2 %451  ;;  %v396_v2 = vpop.permute.xlu0 %395 }
 0x14b   : > { %v1497_v6 = vadd.f32 %v452_v61, %v426_v37  ;;  %v438_v7 = vadd.f32 %v396_v2, %v318_v59  ;;  %v398_v8 = vpop.permute.xlu1 %397 }
 0x14c   : > { %v1499_v9 = vadd.f32 %v398_v8, %v319_v5 }
 0x152   : > { %v458_v10 = vpop.permute.xlu2 %457  ;;  %v442_v12 = vpop.permute.xlu0 %441 }
 0x153   : > { %v1501_v13 = vadd.f32 %v458_v10, %v429_v47  ;;  %v444_v15 = vpop.permute.xlu1 %443  ;;  %v501_v28 = vadd.f32 %v442_v12, %v1445_v21 }
 0x15a   : > { %v464_v16 = vpop.permute.xlu2 %463  ;;  %v448_v17 = vpop.permute.xlu0 %447 }
 0x15b   : > { %v1503_v3 = vadd.f32 %v464_v16, %v432_v56  ;;  %v450_v18 = vpop.permute.xlu1 %449  ;;  %v504_v37 = vadd.f32 %v448_v17, %v1455_v31  ;;  %v502_v31 = vadd.f32 %v444_v15, %v1432_v11 }
 0x162   : > { %v470_v19 = vpop.permute.xlu2 %469  ;;  %v454_v22 = vpop.permute.xlu0 %453 }
 0x163   : > { %v1505_v23 = vadd.f32 %v470_v19, %v435_v0  ;;  %v1507_v24 = vpop.permute.xlu1 %455  ;;  %v507_v21 = vadd.f32 %v454_v22, %v1465_v40  ;;  %v505_v40 = vadd.f32 %v450_v18, %v1435_v14 }
 0x16a   : > { %v476_v25 = vpop.permute.xlu2 %475  ;;  %v460_v26 = vpop.permute.xlu0 %459 }
 0x16b   : > { %v1509_v27 = vadd.f32 %v476_v25, %v438_v7  ;;  %v1511_v30 = vpop.permute.xlu1 %461  ;;  %v510_v46 = vadd.f32 %v460_v26, %v1475_v49 }
 0x172   : > { %v466_v32 = vpop.permute.xlu0 %465  ;;  %v542_v33 = vpop.permute.xlu2 %541 }
 0x173   : > { %v1514_v34 = vpop.permute.xlu1 %467  ;;  %v601_v35 = vadd.f32 %v542_v33, %v501_v28  ;;  %v513_v62 = vadd.f32 %v466_v32, %v1485_v58  ;;  %v508_v28 = vadd.f32 %v1507_v24, %v1443_v20 }
 0x175   : > { %622 = vst.msk [vmem:[#allocation3] sm:$0xff] %vm621_vm5, %v601_v35 }
 0x17a   : > { %v1518_v39 = vpop.permute.xlu0 %471  ;;  %v548_v38 = vpop.permute.xlu2 %547 }
 0x17b   : > { %v1520_v41 = vpop.permute.xlu1 %473  ;;  %v604_v42 = vadd.f32 %v548_v38, %v504_v37 }
 0x17c   : > { %v643_v54 = vld [vmem:[#allocation3] sm:$0xff] }
 0x17d   : > { %625 = vst.msk [vmem:[#allocation3 + $0x18] sm:$0xff] %vm621_vm5, %v604_v42 }
 0x182   : > { %v1524_v43 = vpop.permute.xlu0 %477  ;;  %v554_v44 = vpop.permute.xlu2 %553 }
 0x183   : > { %v1526_v47 = vpop.permute.xlu1 %479  ;;  %v607_v48 = vadd.f32 %v554_v44, %v507_v21 }
 0x184   : > { %v646_v35 = vld [vmem:[#allocation3 + $0x18] sm:$0xff] }
 0x185   : > { %629 = vst.msk [vmem:[#allocation3 + $0x30] sm:$0xff] %vm621_vm5, %v607_v48  ;;  %v516_v48 = vadd.f32 %v1518_v39, %v1492_v4 }
 0x18a   : > { %v544_v50 = vpop.permute.xlu0 %543  ;;  %v560_v51 = vpop.permute.xlu2 %559 }
 0x18b   : > { %v602_v52 = vadd.f32 %v544_v50, %v502_v31  ;;  %v546_v53 = vpop.permute.xlu1 %545  ;;  %v610_v56 = vadd.f32 %v560_v51, %v510_v46 }
 0x18c   : > { %v603_v57 = vadd.f32 %v546_v53, %v503_v63  ;;  %v659_v63 = vmul.f32 -0.069877125, %v643_v54 }
 0x18d   : > { %623 = vst.msk [vmem:[#allocation3 + $0x8] sm:$0xff] %vm621_vm5, %v602_v52 }
 0x18e   : > { %624 = vst.msk [vmem:[#allocation3 + $0x10] sm:$0xff] %vm621_vm5, %v603_v57  ;;  %v662_v57 = vmul.f32 -0.069877125, %v646_v35 }
 0x18f   : > { %632 = vst.msk [vmem:[#allocation3 + $0x48] sm:$0x7] %vm626_vm6, %v610_v56 }
 0x192   : > { %v550_v59 = vpop.permute.xlu0 %549  ;;  %v566_v11 = vpop.permute.xlu2 %565 }
 0x193   : > { %v605_v60 = vadd.f32 %v550_v59, %v505_v40  ;;  %v552_v49 = vpop.permute.xlu1 %551  ;;  %v613_v14 = vadd.f32 %v566_v11, %v513_v62 }
 0x194   : > { %v644_v0 = vld [vmem:[#allocation3 + $0x8] sm:$0xff]  ;;  %v606_v7 = vadd.f32 %v552_v49, %v1497_v6 }
 0x195   : > { %v675_v1 = vld [vmem:[#allocation3 + $0x1] sm:$0xff]  ;;  %v660_v61 = vmul.f32 -0.069877125, %v644_v0  ;;  %v645_v10 = vld [vmem:[#allocation3 + $0x10] sm:$0xff]  ;;  %627 = vst.msk [vmem:[#allocation3 + $0x20] sm:$0x7] %vm626_vm6, %v605_v60 }
 0x196   : > { %v723_v5 = vld [vmem:[#allocation3 + $0x2] sm:$0xff]  ;;  %v691_v2 = vmul.f32 -0.20963137, %v675_v1  ;;  %v661_v17 = vmul.f32 -0.069877125, %v645_v10  ;;  %v677_v18 = vld [vmem:[#allocation3 + $0x11] sm:$0xff] }
 0x197   : > { %v771_v8 = vld [vmem:[#allocation3 + $0x3] sm:$0xff]  ;;  %v739_v16 = vmul.f32 -0.20963137, %v723_v5  ;;  %v693_v22 = vmul.f32 -0.20963137, %v677_v18  ;;  %v725_v25 = vld [vmem:[#allocation3 + $0x12] sm:$0xff]  ;;  %v511_v5 = vadd.f32 %v1511_v30, %v1453_v29 }
 0x198   : > { %v676_v12 = vld [vmem:[#allocation3 + $0x9] sm:$0xff]  ;;  %v707_v15 = vadd.f32 %v691_v2, %v659_v63  ;;  %v787_v6 = vmul.f32 -0.069877125, %v771_v8  ;;  %v773_v33 = vld [vmem:[#allocation3 + $0x13] sm:$0xff]  ;;  %628 = vst.msk [vmem:[#allocation3 + $0x28] sm:$0xff] %vm621_vm5, %v606_v7 }
 0x199   : > { %v724_v19 = vld [vmem:[#allocation3 + $0xa] sm:$0xff]  ;;  %v692_v58 = vmul.f32 -0.20963137, %v676_v12  ;;  %v709_v38 = vadd.f32 %v693_v22, %v661_v17  ;;  %v741_v21 = vmul.f32 -0.20963137, %v725_v25  ;;  %635 = vst.msk [vmem:[#allocation3 + $0x60] sm:$0xff] %vm621_vm5, %v613_v14 }
 0x19a   : > { %v772_v26 = vld [vmem:[#allocation3 + $0xb] sm:$0xff]  ;;  %v755_v32 = vadd.f32 %v739_v16, %v707_v15  ;;  %v740_v42 = vmul.f32 -0.20963137, %v724_v19  ;;  %v556_v44 = vpop.permute.xlu0 %555  ;;  %v572_v50 = vpop.permute.xlu2 %571  ;;  %v789_v53 = vmul.f32 -0.069877125, %v773_v33 }
 0x19b   : > { %v708_v37 = vadd.f32 %v692_v58, %v660_v61  ;;  %v788_v46 = vmul.f32 -0.069877125, %v772_v26  ;;  %v608_v20 = vadd.f32 %v556_v44, %v508_v28  ;;  %v558_v24 = vpop.permute.xlu1 %557  ;;  %v757_v52 = vadd.f32 %v741_v21, %v709_v38  ;;  %v648_v63 = vld [vmem:[#allocation3 + $0x30] sm:$0xff] }
 0x19c   : > { %v803_v31 = vadd.f32 %v787_v6, %v755_v32  ;;  %v609_v56 = vadd.f32 %v558_v24, %v1501_v13  ;;  %v678_v40 = vld [vmem:[#allocation3 + $0x19] sm:$0xff]  ;;  %v616_v11 = vadd.f32 %v572_v50, %v516_v48  ;;  %v664_v18 = vmul.f32 -0.069877125, %v648_v63 }
 0x19d   : > { %v756_v51 = vadd.f32 %v740_v42, %v708_v37  ;;  %v726_v4 = vld [vmem:[#allocation3 + $0x1a] sm:$0xff]  ;;  %v805_v54 = vadd.f32 %v789_v53, %v757_v52  ;;  %v694_v59 = vmul.f32 -0.20963137, %v678_v40  ;;  %630 = vst.msk [vmem:[#allocation3 + $0x38] sm:$0xff] %vm621_vm5, %v608_v20  ;;  %v519_v28 = vadd.f32 %v1524_v43, %v1499_v9 }
 0x19e   : > { %819 = vst.msk [vmem:[%s1547_s28] sm:$0xff] %vm621_vm5, %v803_v31  ;;  %v774_v60 = vld [vmem:[#allocation3 + $0x1b] sm:$0xff]  ;;  %v742_v49 = vmul.f32 -0.20963137, %v726_v4  ;;  %v517_v63 = vadd.f32 %v1520_v41, %v1473_v45 }
 0x19f   : > { %v804_v39 = vadd.f32 %v788_v46, %v756_v51  ;;  %631 = vst.msk [vmem:[#allocation3 + $0x40] sm:$0xff] %vm621_vm5, %v609_v56  ;;  %v710_v13 = vadd.f32 %v694_v59, %v662_v57  ;;  %v647_v62 = vld [vmem:[#allocation3 + $0x28] sm:$0xff]  ;;  %v790_v8 = vmul.f32 -0.069877125, %v774_v60  ;;  %v514_v51 = vadd.f32 %v1514_v34, %v1463_v36 }
 0x1a0   : > { %v679_v0 = vld [vmem:[#allocation3 + $0x29] sm:$0xff]  ;;  %821 = vst.msk [vmem:[%s1547_s28 + $0x10] sm:$0xff] %vm621_vm5, %v805_v54  ;;  %v663_v61 = vmul.f32 -0.069877125, %v647_v62 }
 0x1a1   : > { %820 = vst.msk [vmem:[%s1547_s28 + $0x8] sm:$0xff] %vm621_vm5, %v804_v39  ;;  %v727_v1 = vld [vmem:[#allocation3 + $0x2a] sm:$0xff]  ;;  %v695_v2 = vmul.f32 -0.20963137, %v679_v0  ;;  %v758_v7 = vadd.f32 %v742_v49, %v710_v13 }
 0x1a2   : > { %v775_v10 = vld [vmem:[#allocation3 + $0x2b] sm:$0xff]  ;;  %638 = vst.msk [vmem:[#allocation3 + $0x78] sm:$0xff] %vm621_vm5, %v616_v11  ;;  %v562_v12 = vpop.permute.xlu0 %561  ;;  %v743_v15 = vmul.f32 -0.20963137, %v727_v1  ;;  %v578_v26 = vpop.permute.xlu2 %577 }
 0x1a3   : > { %v711_v14 = vadd.f32 %v695_v2, %v663_v61  ;;  %v611_v16 = vadd.f32 %v562_v12, %v511_v5  ;;  %v564_v17 = vpop.permute.xlu1 %563  ;;  %v806_v19 = vadd.f32 %v790_v8, %v758_v7  ;;  %v791_v29 = vmul.f32 -0.069877125, %v775_v10 }
 0x1a4   : > { %v649_v30 = vld [vmem:[#allocation3 + $0x38] sm:$0xff]  ;;  %v612_v35 = vadd.f32 %v564_v17, %v1503_v3  ;;  %v619_v24 = vadd.f32 %v578_v26, %v519_v28 }
 0x1a5   : > { %v759_v58 = vadd.f32 %v743_v15, %v711_v14  ;;  %v680_v22 = vld [vmem:[#allocation3 + $0x31] sm:$0xff]  ;;  %633 = vst.msk [vmem:[#allocation3 + $0x50] sm:$0xff] %vm621_vm5, %v611_v16  ;;  %v665_v32 = vmul.f32 -0.069877125, %v649_v30 }
 0x1a6   : > { %v728_v25 = vld [vmem:[#allocation3 + $0x32] sm:$0xff]  ;;  %822 = vst.msk [vmem:[%s1547_s28 + $0x18] sm:$0xff] %vm621_vm5, %v806_v19  ;;  %v696_v6 = vmul.f32 -0.20963137, %v680_v22  ;;  %v650_v42 = vld [vmem:[#allocation3 + $0x40] sm:$0xff] }
 0x1a7   : > { %v776_v33 = vld [vmem:[#allocation3 + $0x33] sm:$0xff]  ;;  %v807_v37 = vadd.f32 %v791_v29, %v759_v58  ;;  %v744_v38 = vmul.f32 -0.20963137, %v728_v25  ;;  %v666_v48 = vmul.f32 -0.069877125, %v650_v42  ;;  %v682_v31 = vld [vmem:[#allocation3 + $0x41] sm:$0xff] }
 0x1a8   : > { %v681_v21 = vld [vmem:[#allocation3 + $0x39] sm:$0xff]  ;;  %v712_v44 = vadd.f32 %v696_v6, %v664_v18  ;;  %v792_v9 = vmul.f32 -0.069877125, %v776_v33  ;;  %v698_v43 = vmul.f32 -0.20963137, %v682_v31  ;;  %v730_v50 = vld [vmem:[#allocation3 + $0x42] sm:$0xff] }
 0x1a9   : > { %v697_v46 = vmul.f32 -0.20963137, %v681_v21  ;;  %v729_v20 = vld [vmem:[#allocation3 + $0x3a] sm:$0xff]  ;;  %823 = vst.msk [vmem:[%s1547_s28 + $0x20] sm:$0xff] %vm621_vm5, %v807_v37  ;;  %v778_v57 = vld [vmem:[#allocation3 + $0x43] sm:$0xff] }
 0x1aa   : > { %v760_v52 = vadd.f32 %v744_v38, %v712_v44  ;;  %v745_v53 = vmul.f32 -0.20963137, %v729_v20  ;;  %v777_v56 = vld [vmem:[#allocation3 + $0x3b] sm:$0xff]  ;;  %634 = vst.msk [vmem:[#allocation3 + $0x58] sm:$0xff] %vm621_vm5, %v612_v35  ;;  %v568_v40 = vpop.permute.xlu0 %567  ;;  %v714_v4 = vadd.f32 %v698_v43, %v666_v48  ;;  %v746_v39 = vmul.f32 -0.20963137, %v730_v50 }
 0x1ab   : > { %v713_v3 = vadd.f32 %v697_v46, %v665_v32  ;;  %v570_v54 = vpop.permute.xlu1 %569  ;;  %v793_v60 = vmul.f32 -0.069877125, %v777_v56  ;;  %641 = vst.msk [vmem:[#allocation3 + $0x90] sm:$0xff] %vm621_vm5, %v619_v24  ;;  %v614_v36 = vadd.f32 %v568_v40, %v514_v51  ;;  %v794_v13 = vmul.f32 -0.069877125, %v778_v57  ;;  %v653_v19 = vld [vmem:[#allocation3 + $0x60] sm:$0xff] }
 0x1ac   : > { %v808_v59 = vadd.f32 %v792_v9, %v760_v52  ;;  %v762_v34 = vadd.f32 %v746_v39, %v714_v4  ;;  %v651_v49 = vld [vmem:[#allocation3 + $0x50] sm:$0xff]  ;;  %v615_v1 = vadd.f32 %v570_v54, %v1505_v23  ;;  %v669_v37 = vmul.f32 -0.069877125, %v653_v19  ;;  %v655_v20 = vld [vmem:[#allocation3 + $0x78] sm:$0xff] }
 0x1ad   : > { %v761_v11 = vadd.f32 %v745_v53, %v713_v3  ;;  %636 = vst.msk [vmem:[#allocation3 + $0x68] sm:$0xff] %vm621_vm5, %v614_v36  ;;  %v667_v5 = vmul.f32 -0.069877125, %v651_v49  ;;  %v671_v39 = vmul.f32 -0.069877125, %v655_v20 }
 0x1ae   : > { %824 = vst.msk [vmem:[%s1547_s28 + $0x28] sm:$0xff] %vm621_vm5, %v808_v59  ;;  %v810_v0 = vadd.f32 %v794_v13, %v762_v34 }
 0x1af   : > { %v809_v62 = vadd.f32 %v793_v60, %v761_v11  ;;  %637 = vst.msk [vmem:[#allocation3 + $0x70] sm:$0x7] %vm626_vm6, %v615_v1 }
 0x1b0   : > { %826 = vst.msk [vmem:[%s1547_s28 + $0x38] sm:$0xff] %vm621_vm5, %v810_v0 }
 0x1b1   : > { %825 = vst.msk [vmem:[%s1547_s28 + $0x30] sm:$0xff] %vm621_vm5, %v809_v62  ;;  %v652_v61 = vld [vmem:[#allocation3 + $0x58] sm:$0xff] }
 0x1b2   : > { %v683_v2 = vld [vmem:[#allocation3 + $0x51] sm:$0xff]  ;;  %v684_v7 = vld [vmem:[#allocation3 + $0x59] sm:$0xff]  ;;  %v668_v8 = vmul.f32 -0.069877125, %v652_v61  ;;  %v574_v14 = vpop.permute.xlu0 %573 }
 0x1b3   : > { %v699_v10 = vmul.f32 -0.20963137, %v683_v2  ;;  %v700_v12 = vmul.f32 -0.20963137, %v684_v7  ;;  %v731_v15 = vld [vmem:[#allocation3 + $0x52] sm:$0xff]  ;;  %v732_v16 = vld [vmem:[#allocation3 + $0x5a] sm:$0xff]  ;;  %v617_v23 = vadd.f32 %v574_v14, %v517_v63  ;;  %v576_v18 = vpop.permute.xlu1 %575 }
 0x1b4   : > { %v779_v17 = vld [vmem:[#allocation3 + $0x53] sm:$0xff]  ;;  %v747_v45 = vmul.f32 -0.20963137, %v731_v15  ;;  %v748_v41 = vmul.f32 -0.20963137, %v732_v16  ;;  %v780_v30 = vld [vmem:[#allocation3 + $0x5b] sm:$0xff]  ;;  %v618_v25 = vadd.f32 %v576_v18, %v1509_v27  ;;  %v520_v27 = vadd.f32 %v1526_v47, %v1483_v55 }
 0x1b5   : > { %v715_v58 = vadd.f32 %v699_v10, %v667_v5  ;;  %v716_v29 = vadd.f32 %v700_v12, %v668_v8  ;;  %v795_v22 = vmul.f32 -0.069877125, %v779_v17  ;;  %v796_v32 = vmul.f32 -0.069877125, %v780_v30  ;;  %v654_v6 = vld [vmem:[#allocation3 + $0x68] sm:$0xff]  ;;  %639 = vst.msk [vmem:[#allocation3 + $0x80] sm:$0xff] %vm621_vm5, %v617_v23 }
 0x1b6   : > { %v685_v33 = vld [vmem:[#allocation3 + $0x61] sm:$0xff]  ;;  %640 = vst.msk [vmem:[#allocation3 + $0x88] sm:$0xff] %vm621_vm5, %v618_v25  ;;  %v670_v48 = vmul.f32 -0.069877125, %v654_v6  ;;  %v686_v24 = vld [vmem:[#allocation3 + $0x69] sm:$0xff] }
 0x1b7   : > { %v763_v26 = vadd.f32 %v747_v45, %v715_v58  ;;  %v764_v28 = vadd.f32 %v748_v41, %v716_v29  ;;  %v733_v35 = vld [vmem:[#allocation3 + $0x62] sm:$0xff]  ;;  %v701_v38 = vmul.f32 -0.20963137, %v685_v33  ;;  %v734_v9 = vld [vmem:[#allocation3 + $0x6a] sm:$0xff]  ;;  %v702_v52 = vmul.f32 -0.20963137, %v686_v24 }
 0x1b8   : > { %v781_v44 = vld [vmem:[#allocation3 + $0x63] sm:$0xff]  ;;  %v749_v46 = vmul.f32 -0.20963137, %v733_v35  ;;  %v782_v3 = vld [vmem:[#allocation3 + $0x6b] sm:$0xff]  ;;  %v750_v56 = vmul.f32 -0.20963137, %v734_v9 }
 0x1b9   : > { %v811_v42 = vadd.f32 %v795_v22, %v763_v26  ;;  %v812_v21 = vadd.f32 %v796_v32, %v764_v28  ;;  %v717_v31 = vadd.f32 %v701_v38, %v669_v37  ;;  %v797_v51 = vmul.f32 -0.069877125, %v781_v44  ;;  %v658_v11 = vld [vmem:[#allocation3 + $0x90] sm:$0xff] }
 0x1ba   : > { %v580_v43 = vpop.permute.xlu0 %579  ;;  %v718_v47 = vadd.f32 %v702_v52, %v670_v48  ;;  %v798_v54 = vmul.f32 -0.069877125, %v782_v3  ;;  %v674_v19 = vmul.f32 -0.069877125, %v658_v11 }
 0x1bb   : > { %827 = vst.msk [vmem:[%s1547_s28 + $0x40] sm:$0xff] %vm621_vm5, %v811_v42  ;;  %v765_v50 = vadd.f32 %v749_v46, %v717_v31  ;;  %v620_v53 = vadd.f32 %v580_v43, %v520_v27 }
 0x1bc   : > { %828 = vst.msk [vmem:[%s1547_s28 + $0x48] sm:$0xff] %vm621_vm5, %v812_v21  ;;  %v656_v57 = vld [vmem:[#allocation3 + $0x80] sm:$0xff]  ;;  %v766_v60 = vadd.f32 %v750_v56, %v718_v47 }
 0x1bd   : > { %v813_v55 = vadd.f32 %v797_v51, %v765_v50  ;;  %v687_v40 = vld [vmem:[#allocation3 + $0x79] sm:$0xff]  ;;  %642 = vst.msk [vmem:[#allocation3 + $0x98] sm:$0x7] %vm626_vm6, %v620_v53  ;;  %v672_v36 = vmul.f32 -0.069877125, %v656_v57  ;;  %v657_v13 = vld [vmem:[#allocation3 + $0x88] sm:$0xff] }
 0x1be   : > { %v735_v4 = vld [vmem:[#allocation3 + $0x7a] sm:$0xff]  ;;  %v703_v59 = vmul.f32 -0.20963137, %v687_v40  ;;  %v673_v1 = vmul.f32 -0.069877125, %v657_v13  ;;  %v689_v5 = vld [vmem:[#allocation3 + $0x89] sm:$0xff]  ;;  %v814_v61 = vadd.f32 %v798_v54, %v766_v60 }
 0x1bf   : > { %829 = vst.msk [vmem:[%s1547_s28 + $0x50] sm:$0xff] %vm621_vm5, %v813_v55  ;;  %v783_v34 = vld [vmem:[#allocation3 + $0x7b] sm:$0xff]  ;;  %v751_v0 = vmul.f32 -0.20963137, %v735_v4  ;;  %v705_v7 = vmul.f32 -0.20963137, %v689_v5 }
 0x1c0   : > { %v688_v49 = vld [vmem:[#allocation3 + $0x81] sm:$0xff]  ;;  %v719_v62 = vadd.f32 %v703_v59, %v671_v39  ;;  %v737_v8 = vld [vmem:[#allocation3 + $0x8a] sm:$0xff]  ;;  %v799_v14 = vmul.f32 -0.069877125, %v783_v34  ;;  %830 = vst.msk [vmem:[%s1547_s28 + $0x58] sm:$0xff] %vm621_vm5, %v814_v61 }
 0x1c1   : > { %v736_v63 = vld [vmem:[#allocation3 + $0x82] sm:$0xff]  ;;  %v704_v2 = vmul.f32 -0.20963137, %v688_v49  ;;  %v785_v15 = vld [vmem:[#allocation3 + $0x8b] sm:$0xff]  ;;  %v721_v17 = vadd.f32 %v705_v7, %v673_v1  ;;  %v753_v18 = vmul.f32 -0.20963137, %v737_v8 }
 0x1c2   : > { %v784_v10 = vld [vmem:[#allocation3 + $0x83] sm:$0xff]  ;;  %v767_v12 = vadd.f32 %v751_v0, %v719_v62  ;;  %v752_v23 = vmul.f32 -0.20963137, %v736_v63  ;;  %v801_v25 = vmul.f32 -0.069877125, %v785_v15 }
 0x1c3   : > { %v720_v16 = vadd.f32 %v704_v2, %v672_v36  ;;  %v800_v29 = vmul.f32 -0.069877125, %v784_v10  ;;  %v769_v22 = vadd.f32 %v753_v18, %v721_v17 }
 0x1c4   : > { %v815_v58 = vadd.f32 %v799_v14, %v767_v12  ;;  %v690_v45 = vld [vmem:[#allocation3 + $0x91] sm:$0xff] }
 0x1c5   : > { %v738_v41 = vld [vmem:[#allocation3 + $0x92] sm:$0xff]  ;;  %v768_v30 = vadd.f32 %v752_v23, %v720_v16  ;;  %v706_v26 = vmul.f32 -0.20963137, %v690_v45  ;;  %v817_v6 = vadd.f32 %v801_v25, %v769_v22 }
 0x1c6   : > { %831 = vst.msk [vmem:[%s1547_s28 + $0x60] sm:$0xff] %vm621_vm5, %v815_v58  ;;  %v786_v28 = vld [vmem:[#allocation3 + $0x93] sm:$0xff]  ;;  %v754_v35 = vmul.f32 -0.20963137, %v738_v41 }
 0x1c7   : > { %v816_v32 = vadd.f32 %v800_v29, %v768_v30  ;;  %v722_v33 = vadd.f32 %v706_v26, %v674_v19  ;;  %v802_v38 = vmul.f32 -0.069877125, %v786_v28  ;;  %833 = vst.msk [vmem:[%s1547_s28 + $0x70] sm:$0xff] %vm621_vm5, %v817_v6 }
 0x1c9   : > { %832 = vst.msk [vmem:[%s1547_s28 + $0x68] sm:$0xff] %vm621_vm5, %v816_v32  ;;  %v770_v37 = vadd.f32 %v754_v35, %v722_v33 }
 0x1cb   : > { %v818_v42 = vadd.f32 %v802_v38, %v770_v37 }
 0x1cd   : > { %834 = vst.msk [vmem:[%s1547_s28 + $0x78] sm:$0xff] %vm621_vm5, %v818_v42 }
 0x1ce   : > { %1057 = shalt.err (!%p1054_p4)
}
 0x1cf   : > { %s1105_s21 = smov 128   ;;  %s1106_s24 = smov 8  }
 0x1d0   : > { %947 = dma.vmem_to_hbm [thread:$0]  (%p1167_p11), %s850_s10, 2048, %s852_s4, %s836_s5, %s1105_s21, %s1105_s21, %s1106_s24  }
 0x1d1 PF: > { %s866_s25 = sand.u32 1, %s1084_s6   ;;  %p1648_p7 = scmp.ge.s32.totalorder %s1096_s9, 2 }
 0x1d2   : > { %s867_s17 = scalar_lea.sflag [#allocation6], %s866_s25 }
 0x1d3   : > { %p954_p5 = pnand %p1648_p7, %p1171_p12 }
 0x1d5   : > { %p955_p8 = pneg %p954_p5 }
 0x1d7   : > { %1079 = dma.done.wait (%p955_p8), %s867_s17, 2048  }
 0x1d8   : > { %1081 = vsyncadd (%p955_p8), %s867_s17, 4294965248  ;;  %p14_p10 = scmp.ge.s32.totalorder %s1142_s12, 4   ;;  %s1649_s6 = smov %s1088_s7 }
 0x1d9   : > { %s1650_s7 = smov %s1092_s8  ;;  %s1651_s8 = smov %s1154_s15 }
 0x1da   : > { %s1652_s9 = smov %s1142_s12  ;;  %16 = sbr.rel (!%p14_p10) target bundleno = 5 (0x5), region = 69 }
 0x1df   :  { %873 = vsyncpa [#allocation5], 1 }
 0x1e0   :  { %875 = vsyncpa [#allocation5 + $0x1], 1 }
 0x1e1   :  { %876 = vsyncpa [#allocation6], 1 }
 0x1e2   :  { %878 = vsyncpa [#allocation6 + $0x1], 1 }

</bundles_post_ra>
